<compile_context>
chip_gen: v7x
topology: tpu7x:2x2x1
jax: 0.10.0
libtpu: 0.0.40
codegen_flags: <defaults>
</compile_context>

<pallas_src>
import numpy as np
import jax
import jax.numpy as jnp
from jax.experimental import pallas as pl
from jax.experimental.pallas import tpu as pltpu


# ----------------------------------------------------------------------------
# Host-side construction of the exact linear operators
# ----------------------------------------------------------------------------
def adaptive_pool_matrix(out_size, in_size):
    """P[i, h] with pooled[i] = sum_h P[i, h] * x[h]  (PyTorch AdaptiveAvgPool2d)."""
    P = np.zeros((out_size, in_size), dtype=np.float32)
    for i in range(out_size):
        start = (i * in_size) // out_size
        end = -(-((i + 1) * in_size) // out_size)  # ceil
        P[i, start:end] = 1.0 / float(end - start)
    return P


def bilinear_upsample_matrix(out_size, in_size):
    """U[h, i] with up[h] = sum_i U[h, i] * x[i]  (bilinear, align_corners=True)."""
    U = np.zeros((out_size, in_size), dtype=np.float32)
    if in_size == 1:
        U[:, 0] = 1.0
        return U
    for h in range(out_size):
        src = h * (in_size - 1) / (out_size - 1) if out_size > 1 else 0.0
        i0 = min(int(np.floor(src)), in_size - 1)
        i1 = min(i0 + 1, in_size - 1)
        frac = src - i0
        U[h, i0] += 1.0 - frac
        U[h, i1] += frac
    return U


def _pick_c_tile(C, target):
    """Largest divisor of C that is <= target and 8/16/32-aligned; else C (no C tiling)."""
    if C <= target:
        return C
    for align in (32, 16, 8):
        for ct in range(min(target, C), align - 1, -1):
            if ct % align == 0 and C % ct == 0:
                return ct
    return C


# ----------------------------------------------------------------------------
# Fused PPM kernel: all bins, one read of x, C-tiled with a small accumulator
# ----------------------------------------------------------------------------
def _make_ppm_kernel(C, Ct, K, Brd):
    """grid = (N, K). Refs:
         x_ref    (Ct, HW)     compute dtype  -- channel tile of x
         w_ref    (Brd, Ct)    compute dtype  -- stacked BN-folded 1x1 conv weights
         pk_ref   (HW, B2)     compute dtype  -- all-bin adaptive-avg-pool matrix
         uk_ref   (B2, HW)     compute dtype  -- all-bin bilinear upsample matrix
         bias_ref (Brd, 1)     f32            -- folded BN bias
         mask_ref (Brd, B2)    f32            -- keeps each bin's own pooled columns
         o_ref    (C+Brd, HW)  f32            -- final concatenated output (resident over K)
         acc_ref  (Brd, B2)    f32 VMEM scratch (stacked conv accumulator)
    """

    def kernel(x_ref, w_ref, pk_ref, uk_ref, bias_ref, mask_ref, o_ref, acc_ref):
        k = pl.program_id(1)

        @pl.when(k == 0)
        def _():
            acc_ref[...] = jnp.zeros_like(acc_ref)

        xt = x_ref[...]                                                    # (Ct, HW)
        # adaptive average pooling for every bin at once: (Ct, sum b^2)
        pooled = jnp.dot(xt, pk_ref[...], preferred_element_type=jnp.float32)
        # partial stacked 1x1 conv (BN scale already folded into w): (Brd, sum b^2)
        acc_ref[...] += jnp.dot(w_ref[...], pooled.astype(w_ref.dtype),
                                preferred_element_type=jnp.float32)

        # passthrough: copy this channel tile of x into the concatenated output
        # (eliminates the torch.cat / jnp.concatenate round-trip through HBM).
        if K == 1:
            o_ref[0:Ct, :] = xt.astype(o_ref.dtype)
        else:
            row = pl.multiple_of(k * Ct, 8)        # Ct is 8-aligned whenever K > 1
            o_ref[pl.ds(row, Ct), :] = xt.astype(o_ref.dtype)

        @pl.when(k == K - 1)
        def _():
            # folded BN bias + ReLU, then zero the off-bin blocks of the stacked conv
            a = jnp.maximum(acc_ref[...] + bias_ref[...], 0.0) * mask_ref[...]
            # bilinear upsample of every bin in one lane-dense matmul: (Brd, HW)
            y = jnp.dot(a.astype(uk_ref.dtype), uk_ref[...],
                        preferred_element_type=jnp.float32).astype(o_ref.dtype)
            if C % 8 == 0:
                o_ref[C:C + Brd, :] = y
            else:
                # channel offset not sublane-aligned (tiny demo shapes): per-row stores
                for r in range(Brd):
                    o_ref[C + r:C + r + 1, :] = y[r:r + 1, :]

    return kernel


def ppm_fused_forward(x2, w_all, pk_all, uk_all, bias_all, mask, *, c_tile_target=512):
    """x2: (N, C, HW) compute dtype -> (N, C + B*rd, HW) float32 ([x, branches...])."""
    N, C, HW = x2.shape
    Brd, B2 = mask.shape
    assert w_all.shape == (Brd, C)
    Ct = _pick_c_tile(C, c_tile_target)
    K = C // Ct
    C_out = C + Brd
    out_dtype = jnp.float32

    kernel = _make_ppm_kernel(C, Ct, K, Brd)

    # Advisory cost estimate (pooling + stacked conv + stacked upsample matmuls).
    flops = 2 * N * (C * HW * B2 + Brd * C * B2 + Brd * B2 * HW)
    bytes_accessed = (x2.size * x2.dtype.itemsize
                      + w_all.size * w_all.dtype.itemsize
                      + pk_all.size * pk_all.dtype.itemsize
                      + uk_all.size * uk_all.dtype.itemsize
                      + N * C_out * HW * np.dtype(out_dtype).itemsize)

    # VMEM budget: double-buffered x / W tiles + per-batch resident output block +
    # operator matrices. Generation note: keep under ~48 MiB for v7x (64 MiB VMEM);
    # c_tile_target=512 does that at PSPNet sizes, v6e/v5e can go larger.
    cd_size = x2.dtype.itemsize
    est_vmem = (2 * Ct * HW * cd_size + 2 * Brd * Ct * cd_size
                + 2 * C_out * HW * np.dtype(out_dtype).itemsize
                + (HW * B2 + B2 * HW) * cd_size
                + Brd * (B2 + 1) * 4 + Brd * B2 * 4)
    vmem_limit = int(min(max(2 * est_vmem + (8 << 20), 32 << 20), 64 << 20))

    return pl.pallas_call(
        kernel,
        out_shape=jax.ShapeDtypeStruct((N, C_out, HW), out_dtype),
        grid=(N, K),
        in_specs=[
            pl.BlockSpec((None, Ct, HW), lambda n, k: (n, k, 0)),  # x channel tile
            pl.BlockSpec((Brd, Ct), lambda n, k: (0, k)),          # stacked conv weight tile
            pl.BlockSpec((HW, B2), lambda n, k: (0, 0)),           # all-bin pooling matrix
            pl.BlockSpec((B2, HW), lambda n, k: (0, 0)),           # all-bin upsample matrix
            pl.BlockSpec((Brd, 1), lambda n, k: (0, 0)),           # folded BN bias
            pl.BlockSpec((Brd, B2), lambda n, k: (0, 0)),          # bin-block mask
        ],
        out_specs=pl.BlockSpec((None, C_out, HW), lambda n, k: (n, 0, 0)),
        scratch_shapes=[pltpu.VMEM((Brd, B2), jnp.float32)],
        compiler_params=pltpu.CompilerParams(
            dimension_semantics=("parallel", "arbitrary"),
            vmem_limit_bytes=vmem_limit),
        cost_estimate=pl.CostEstimate(flops=int(flops), transcendentals=0,
                                      bytes_accessed=int(bytes_accessed)),
    )(x2, w_all, pk_all, uk_all, bias_all, mask)


# ----------------------------------------------------------------------------
# Module wrapper
# ----------------------------------------------------------------------------
class PPMPallas:
    """Pallas-TPU PPM. BatchNorm is inference-mode (running stats folded)."""

    def __init__(self, in_dim, reduction_dim, bins, key, *,
                 compute_dtype=jnp.bfloat16, c_tile_target=512):
        self.in_dim = in_dim
        self.reduction_dim = reduction_dim
        self.bins = tuple(bins)
        self.compute_dtype = compute_dtype
        self.c_tile_target = c_tile_target
        self.eps = 1e-5

        raw_params = []
        w_rows, b_rows = [], []
        for _ in self.bins:
            key, k1, k2, k3, k4, k5 = jax.random.split(key, 6)
            conv_w = 0.1 * jax.random.normal(k1, (reduction_dim, in_dim), jnp.float32)
            gamma = 1.0 + 0.1 * jax.random.normal(k2, (reduction_dim,), jnp.float32)
            beta = 0.1 * jax.random.normal(k3, (reduction_dim,), jnp.float32)
            running_mean = 0.1 * jax.random.normal(k4, (reduction_dim,), jnp.float32)
            running_var = jnp.abs(jax.random.normal(k5, (reduction_dim,), jnp.float32)) + 0.5
            raw_params.append((conv_w, gamma, beta, running_mean, running_var))
            scale = gamma / jnp.sqrt(running_var + self.eps)
            w_rows.append(scale[:, None] * conv_w)               # BN scale folded into conv
            b_rows.append((beta - running_mean * scale)[:, None])
        self.raw_params = raw_params                             # for the independent reference

        nb = len(self.bins)
        self.w_all = jnp.concatenate(w_rows, axis=0).astype(compute_dtype)   # (nb*rd, C)
        self.bias_all = jnp.concatenate(b_rows, axis=0).astype(jnp.float32)  # (nb*rd, 1)

        # 0/1 mask: the row block of bin b keeps only bin b's pooled columns
        b2s = [b * b for b in self.bins]
        B2 = int(np.sum(b2s))
        mask = np.zeros((nb * reduction_dim, B2), dtype=np.float32)
        off = 0
        for bi, b2 in enumerate(b2s):
            mask[bi * reduction_dim:(bi + 1) * reduction_dim, off:off + b2] = 1.0
            off += b2
        self.mask = jnp.asarray(mask)

        self._spatial_cache = {}   # (H, W) -> (Pk_all, Uk_all), built once, device resident

    def _spatial_operators(self, H, W):
        key = (H, W)
        if key not in self._spatial_cache:
            pk_cols, uk_rows = [], []
            for b in self.bins:
                Ph = adaptive_pool_matrix(b, H)
                Pw = adaptive_pool_matrix(b, W)
                Uh = bilinear_upsample_matrix(H, b)
                Uw = bilinear_upsample_matrix(W, b)
                pk_cols.append(np.kron(Ph, Pw).T)   # (H*W, b*b)
                uk_rows.append(np.kron(Uh, Uw).T)   # (b*b, H*W)
            pk_all = jnp.asarray(np.concatenate(pk_cols, axis=1), dtype=self.compute_dtype)
            uk_all = jnp.asarray(np.concatenate(uk_rows, axis=0), dtype=self.compute_dtype)
            self._spatial_cache[key] = (pk_all, uk_all)
        return self._spatial_cache[key]

    def __call__(self, x):
        N, C, H, W = x.shape
        assert C == self.in_dim
        pk_all, uk_all = self._spatial_operators(H, W)
        # NOTE: with compute_dtype=bfloat16 the passthrough channels are bf16-rounded;
        # use compute_dtype=float32 for a bit-exact passthrough of x.
        x2 = x.reshape(N, C, H * W).astype(self.compute_dtype)
        out2 = ppm_fused_forward(x2, self.w_all, pk_all, uk_all, self.bias_all,
                                 self.mask, c_tile_target=self.c_tile_target)
        C_out = C + len(self.bins) * self.reduction_dim
        return out2.reshape(N, C_out, H, W)


# ----------------------------------------------------------------------------
# Pure-JAX reference (independent separable-einsum path) for verification
# ----------------------------------------------------------------------------
def ppm_reference(x, module):
    N, C, H, W = x.shape
    outs = [x]
    for b, (conv_w, gamma, beta, mean, var) in zip(module.bins, module.raw_params):
        Ph = jnp.asarray(adaptive_pool_matrix(b, H))
        Pw = jnp.asarray(adaptive_pool_matrix(b, W))
        Uh = jnp.asarray(bilinear_upsample_matrix(H, b))
        Uw = jnp.asarray(bilinear_upsample_matrix(W, b))
        pooled = jnp.einsum("nchw,ih,jw->ncij", x, Ph, Pw)
        z = jnp.einsum("rc,ncij->nrij", conv_w, pooled)
        scale = gamma / jnp.sqrt(var + module.eps)
        bias = beta - mean * scale
        a = jnp.maximum(z * scale[None, :, None, None] + bias[None, :, None, None], 0.0)
        y = jnp.einsum("nrij,hi,wj->nrhw", a, Uh, Uw)
        outs.append(y)
    return jnp.concatenate(outs, axis=1)


if __name__ == "__main__":
    key = jax.random.PRNGKey(0)
    key, xkey = jax.random.split(key)

    # Small demo shapes: batch=2, in_dim=4, H=W=16, reduction_dim=2, bins=(1,2,3,6)
    N, C, H, W = 2, 4, 16, 16
    reduction_dim = 2
    bins = (1, 2, 3, 6)
    expected_channels = C + reduction_dim * len(bins)

    x = jax.random.normal(xkey, (N, C, H, W), jnp.float32)

    # Exactness config: f32 streaming end-to-end, tight tolerance vs. the reference.
    mod_f32 = PPMPallas(C, reduction_dim, bins, key, compute_dtype=jnp.float32)
    out_f32 = jax.block_until_ready(mod_f32(x))
    assert out_f32.shape == (N, expected_channels, H, W), out_f32.shape
    ref = jax.block_until_ready(ppm_reference(x, mod_f32))
    np.testing.assert_allclose(np.asarray(out_f32), np.asarray(ref), rtol=1e-4, atol=1e-4)

    # Production config (default): bf16-streamed operands (halves HBM bytes of the
    # dominant x stream), f32 MXU accumulation -> looser tolerance vs. f32 reference.
    mod_bf16 = PPMPallas(C, reduction_dim, bins, key)   # compute_dtype=bfloat16 (same params)
    out_bf16 = jax.block_until_ready(mod_bf16(x))
    assert out_bf16.shape == (N, expected_channels, H, W), out_bf16.shape
    np.testing.assert_allclose(np.asarray(out_bf16), np.asarray(ref), rtol=3e-2, atol=3e-2)

    print("KERNEL_OK")
</pallas_src>

<mosaic_0001>
module attributes {stable_mosaic.version = 11 : i64} {
  func.func @kernel(%arg0: i32, %arg1: i32, %arg2: memref<1x4x256xf32, #tpu.memory_space<vmem>>, %arg3: memref<8x4xf32, #tpu.memory_space<vmem>>, %arg4: memref<256x50xf32, #tpu.memory_space<vmem>>, %arg5: memref<50x256xf32, #tpu.memory_space<vmem>>, %arg6: memref<8x1xf32, #tpu.memory_space<vmem>>, %arg7: memref<8x50xf32, #tpu.memory_space<vmem>>, %arg8: memref<1x12x256xf32, #tpu.memory_space<vmem>>, %arg9: memref<8x50xf32, #tpu.memory_space<vmem>>) attributes {dimension_semantics = [#tpu.dimension_semantics<parallel>, #tpu.dimension_semantics<arbitrary>], iteration_bounds = array<i64: 2, 1>, scalar_prefetch = 0 : i64, scratch_operands = 1 : i64, tpu.core_type = #tpu.core_type<tc>, window_params = [{transform_indices = @transform_0, window_bounds = array<i64: 1, 4, 256>}, {transform_indices = @transform_1, window_bounds = array<i64: 8, 4>}, {pipeline_mode = #tpu.pipeline_mode<synchronous>, transform_indices = @transform_2, window_bounds = array<i64: 256, 50>}, {pipeline_mode = #tpu.pipeline_mode<synchronous>, transform_indices = @transform_3, window_bounds = array<i64: 50, 256>}, {pipeline_mode = #tpu.pipeline_mode<synchronous>, transform_indices = @transform_4, window_bounds = array<i64: 8, 1>}, {pipeline_mode = #tpu.pipeline_mode<synchronous>, transform_indices = @transform_5, window_bounds = array<i64: 8, 50>}, {transform_indices = @transform_6, window_bounds = array<i64: 1, 12, 256>}]} {
    %c0_i32 = arith.constant 0 : i32
    %0 = arith.cmpi eq, %arg1, %c0_i32 : i32
    %1 = arith.extui %0 : i1 to i32
    %c0_i32_0 = arith.constant 0 : i32
    %2 = arith.cmpi ne, %1, %c0_i32_0 : i32
    scf.if %2 {
      %cst_17 = arith.constant 0.000000e+00 : f32
      %18 = vector.broadcast %cst_17 : f32 to vector<8x50xf32>
      %c0_18 = arith.constant 0 : index
      %c0_19 = arith.constant 0 : index
      %19 = vector.load %arg9[%c0_18, %c0_19] : memref<8x50xf32, #tpu.memory_space<vmem>>, vector<8x50xf32>
      tpu.vector_store %arg9[%c0_18, %c0_19], %18 {strides = array<i32>} : memref<8x50xf32, #tpu.memory_space<vmem>>, vector<8x50xf32>,
    } else {
    }
    %c0 = arith.constant 0 : index
    %c0_1 = arith.constant 0 : index
    %c0_2 = arith.constant 0 : index
    %3 = vector.load %arg2[%c0, %c0_1, %c0_2] : memref<1x4x256xf32, #tpu.memory_space<vmem>>, vector<1x4x256xf32>
    %4 = vector.shape_cast %3 : vector<1x4x256xf32> to vector<4x256xf32>
    %c0_3 = arith.constant 0 : index
    %c0_4 = arith.constant 0 : index
    %5 = vector.load %arg4[%c0_3, %c0_4] : memref<256x50xf32, #tpu.memory_space<vmem>>, vector<256x50xf32>
    %cst = arith.constant dense<0.000000e+00> : vector<4x50xf32>
    %6 = tpu.matmul %4, %5, %cst {dimension_numbers = #tpu.dot_dimension_numbers<[1], [0], [0], [1], [0, 0, 1, 1], [], []>} : vector<4x256xf32>, vector<256x50xf32>, vector<4x50xf32> -> vector<4x50xf32>
    %c0_5 = arith.constant 0 : index
    %c0_6 = arith.constant 0 : index
    %7 = vector.load %arg9[%c0_5, %c0_6] : memref<8x50xf32, #tpu.memory_space<vmem>>, vector<8x50xf32>
    %c0_7 = arith.constant 0 : index
    %c0_8 = arith.constant 0 : index
    %8 = vector.load %arg3[%c0_7, %c0_8] : memref<8x4xf32, #tpu.memory_space<vmem>>, vector<8x4xf32>
    %cst_9 = arith.constant dense<0.000000e+00> : vector<8x50xf32>
    %9 = tpu.matmul %8, %6, %cst_9 {dimension_numbers = #tpu.dot_dimension_numbers<[1], [0], [0], [1], [0, 0, 1, 1], [], []>} : vector<8x4xf32>, vector<4x50xf32>, vector<8x50xf32> -> vector<8x50xf32>
    %10 = arith.addf %7, %9 : vector<8x50xf32>
    %c0_10 = arith.constant 0 : index
    %c0_11 = arith.constant 0 : index
    %11 = vector.load %arg9[%c0_10, %c0_11] : memref<8x50xf32, #tpu.memory_space<vmem>>, vector<8x50xf32>
    tpu.vector_store %arg9[%c0_10, %c0_11], %10 {strides = array<i32>} : memref<8x50xf32, #tpu.memory_space<vmem>>, vector<8x50xf32>,
    %c0_12 = arith.constant 0 : index
    %c0_13 = arith.constant 0 : index
    %c0_14 = arith.constant 0 : index
    %12 = vector.load %arg8[%c0_12, %c0_13, %c0_14] : memref<1x12x256xf32, #tpu.memory_space<vmem>>, vector<1x4x256xf32>
    %13 = vector.shape_cast %12 : vector<1x4x256xf32> to vector<4x256xf32>
    %14 = vector.shape_cast %4 : vector<4x256xf32> to vector<1x4x256xf32>
    tpu.vector_store %arg8[%c0_12, %c0_13, %c0_14], %14 {strides = array<i32>} : memref<1x12x256xf32, #tpu.memory_space<vmem>>, vector<1x4x256xf32>,
    %c0_i32_15 = arith.constant 0 : i32
    %15 = arith.cmpi eq, %arg1, %c0_i32_15 : i32
    %16 = arith.extui %15 : i1 to i32
    %c0_i32_16 = arith.constant 0 : i32
    %17 = arith.cmpi ne, %16, %c0_i32_16 : i32
    scf.if %17 {
      %c0_17 = arith.constant 0 : index
      %c0_18 = arith.constant 0 : index
      %18 = vector.load %arg9[%c0_17, %c0_18] : memref<8x50xf32, #tpu.memory_space<vmem>>, vector<8x50xf32>
      %c0_19 = arith.constant 0 : index
      %c0_20 = arith.constant 0 : index
      %19 = vector.load %arg6[%c0_19, %c0_20] : memref<8x1xf32, #tpu.memory_space<vmem>>, vector<8x1xf32>
      %20 = vector.broadcast %19 : vector<8x1xf32> to vector<8x50xf32>
      %21 = arith.addf %18, %20 : vector<8x50xf32>
      %cst_21 = arith.constant 0.000000e+00 : f32
      %22 = vector.broadcast %cst_21 : f32 to vector<8x50xf32>
      %23 = arith.maximumf %21, %22 : vector<8x50xf32>
      %c0_22 = arith.constant 0 : index
      %c0_23 = arith.constant 0 : index
      %24 = vector.load %arg7[%c0_22, %c0_23] : memref<8x50xf32, #tpu.memory_space<vmem>>, vector<8x50xf32>
      %25 = arith.mulf %23, %24 : vector<8x50xf32>
      %c0_24 = arith.constant 0 : index
      %c0_25 = arith.constant 0 : index
      %26 = vector.load %arg5[%c0_24, %c0_25] : memref<50x256xf32, #tpu.memory_space<vmem>>, vector<50x256xf32>
      %cst_26 = arith.constant dense<0.000000e+00> : vector<8x256xf32>
      %27 = tpu.matmul %25, %26, %cst_26 {dimension_numbers = #tpu.dot_dimension_numbers<[1], [0], [0], [1], [0, 0, 1, 1], [], []>} : vector<8x50xf32>, vector<50x256xf32>, vector<8x256xf32> -> vector<8x256xf32>
      %28 = vector.extract_strided_slice %27 {offsets = [0, 0], sizes = [1, 256], strides = [1, 1]} : vector<8x256xf32> to vector<1x256xf32>
      %c0_27 = arith.constant 0 : index
      %c4 = arith.constant 4 : index
      %c0_28 = arith.constant 0 : index
      %29 = vector.load %arg8[%c0_27, %c4, %c0_28] : memref<1x12x256xf32, #tpu.memory_space<vmem>>, vector<1x1x256xf32>
      %30 = vector.shape_cast %29 : vector<1x1x256xf32> to vector<1x256xf32>
      %31 = vector.shape_cast %28 : vector<1x256xf32> to vector<1x1x256xf32>
      tpu.vector_store %arg8[%c0_27, %c4, %c0_28], %31 {strides = array<i32>} : memref<1x12x256xf32, #tpu.memory_space<vmem>>, vector<1x1x256xf32>,
      %32 = vector.extract_strided_slice %27 {offsets = [1, 0], sizes = [1, 256], strides = [1, 1]} : vector<8x256xf32> to vector<1x256xf32>
      %c0_29 = arith.constant 0 : index
      %c5 = arith.constant 5 : index
      %c0_30 = arith.constant 0 : index
      %33 = vector.load %arg8[%c0_29, %c5, %c0_30] : memref<1x12x256xf32, #tpu.memory_space<vmem>>, vector<1x1x256xf32>
      %34 = vector.shape_cast %33 : vector<1x1x256xf32> to vector<1x256xf32>
      %35 = vector.shape_cast %32 : vector<1x256xf32> to vector<1x1x256xf32>
      tpu.vector_store %arg8[%c0_29, %c5, %c0_30], %35 {strides = array<i32>} : memref<1x12x256xf32, #tpu.memory_space<vmem>>, vector<1x1x256xf32>,
      %36 = vector.extract_strided_slice %27 {offsets = [2, 0], sizes = [1, 256], strides = [1, 1]} : vector<8x256xf32> to vector<1x256xf32>
      %c0_31 = arith.constant 0 : index
      %c6 = arith.constant 6 : index
      %c0_32 = arith.constant 0 : index
      %37 = vector.load %arg8[%c0_31, %c6, %c0_32] : memref<1x12x256xf32, #tpu.memory_space<vmem>>, vector<1x1x256xf32>
      %38 = vector.shape_cast %37 : vector<1x1x256xf32> to vector<1x256xf32>
      %39 = vector.shape_cast %36 : vector<1x256xf32> to vector<1x1x256xf32>
      tpu.vector_store %arg8[%c0_31, %c6, %c0_32], %39 {strides = array<i32>} : memref<1x12x256xf32, #tpu.memory_space<vmem>>, vector<1x1x256xf32>,
      %40 = vector.extract_strided_slice %27 {offsets = [3, 0], sizes = [1, 256], strides = [1, 1]} : vector<8x256xf32> to vector<1x256xf32>
      %c0_33 = arith.constant 0 : index
      %c7 = arith.constant 7 : index
      %c0_34 = arith.constant 0 : index
      %41 = vector.load %arg8[%c0_33, %c7, %c0_34] : memref<1x12x256xf32, #tpu.memory_space<vmem>>, vector<1x1x256xf32>
      %42 = vector.shape_cast %41 : vector<1x1x256xf32> to vector<1x256xf32>
      %43 = vector.shape_cast %40 : vector<1x256xf32> to vector<1x1x256xf32>
      tpu.vector_store %arg8[%c0_33, %c7, %c0_34], %43 {strides = array<i32>} : memref<1x12x256xf32, #tpu.memory_space<vmem>>, vector<1x1x256xf32>,
      %44 = vector.extract_strided_slice %27 {offsets = [4, 0], sizes = [1, 256], strides = [1, 1]} : vector<8x256xf32> to vector<1x256xf32>
      %c0_35 = arith.constant 0 : index
      %c8 = arith.constant 8 : index
      %c0_36 = arith.constant 0 : index
      %45 = vector.load %arg8[%c0_35, %c8, %c0_36] : memref<1x12x256xf32, #tpu.memory_space<vmem>>, vector<1x1x256xf32>
      %46 = vector.shape_cast %45 : vector<1x1x256xf32> to vector<1x256xf32>
      %47 = vector.shape_cast %44 : vector<1x256xf32> to vector<1x1x256xf32>
      tpu.vector_store %arg8[%c0_35, %c8, %c0_36], %47 {strides = array<i32>} : memref<1x12x256xf32, #tpu.memory_space<vmem>>, vector<1x1x256xf32>,
      %48 = vector.extract_strided_slice %27 {offsets = [5, 0], sizes = [1, 256], strides = [1, 1]} : vector<8x256xf32> to vector<1x256xf32>
      %c0_37 = arith.constant 0 : index
      %c9 = arith.constant 9 : index
      %c0_38 = arith.constant 0 : index
      %49 = vector.load %arg8[%c0_37, %c9, %c0_38] : memref<1x12x256xf32, #tpu.memory_space<vmem>>, vector<1x1x256xf32>
      %50 = vector.shape_cast %49 : vector<1x1x256xf32> to vector<1x256xf32>
      %51 = vector.shape_cast %48 : vector<1x256xf32> to vector<1x1x256xf32>
      tpu.vector_store %arg8[%c0_37, %c9, %c0_38], %51 {strides = array<i32>} : memref<1x12x256xf32, #tpu.memory_space<vmem>>, vector<1x1x256xf32>,
      %52 = vector.extract_strided_slice %27 {offsets = [6, 0], sizes = [1, 256], strides = [1, 1]} : vector<8x256xf32> to vector<1x256xf32>
      %c0_39 = arith.constant 0 : index
      %c10 = arith.constant 10 : index
      %c0_40 = arith.constant 0 : index
      %53 = vector.load %arg8[%c0_39, %c10, %c0_40] : memref<1x12x256xf32, #tpu.memory_space<vmem>>, vector<1x1x256xf32>
      %54 = vector.shape_cast %53 : vector<1x1x256xf32> to vector<1x256xf32>
      %55 = vector.shape_cast %52 : vector<1x256xf32> to vector<1x1x256xf32>
      tpu.vector_store %arg8[%c0_39, %c10, %c0_40], %55 {strides = array<i32>} : memref<1x12x256xf32, #tpu.memory_space<vmem>>, vector<1x1x256xf32>,
      %56 = vector.extract_strided_slice %27 {offsets = [7, 0], sizes = [1, 256], strides = [1, 1]} : vector<8x256xf32> to vector<1x256xf32>
      %c0_41 = arith.constant 0 : index
      %c11 = arith.constant 11 : index
      %c0_42 = arith.constant 0 : index
      %57 = vector.load %arg8[%c0_41, %c11, %c0_42] : memref<1x12x256xf32, #tpu.memory_space<vmem>>, vector<1x1x256xf32>
      %58 = vector.shape_cast %57 : vector<1x1x256xf32> to vector<1x256xf32>
      %59 = vector.shape_cast %56 : vector<1x256xf32> to vector<1x1x256xf32>
      tpu.vector_store %arg8[%c0_41, %c11, %c0_42], %59 {strides = array<i32>} : memref<1x12x256xf32, #tpu.memory_space<vmem>>, vector<1x1x256xf32>,
    } else {
    }
    return
  }
  func.func @transform_0(%arg0: i32, %arg1: i32) -> (i32, i32, i32) {
    %c0_i32 = arith.constant 0 : i32
    %c0_i32_0 = arith.constant 0 : i32
    return %arg0, %arg1, %c0_i32 : i32, i32, i32
  }
  func.func @transform_1(%arg0: i32, %arg1: i32) -> (i32, i32) {
    %c0_i32 = arith.constant 0 : i32
    %c0_i32_0 = arith.constant 0 : i32
    return %c0_i32, %arg1 : i32, i32
  }
  func.func @transform_2(%arg0: i32, %arg1: i32) -> (i32, i32) {
    %c0_i32 = arith.constant 0 : i32
    %c0_i32_0 = arith.constant 0 : i32
    %c0_i32_1 = arith.constant 0 : i32
    return %c0_i32, %c0_i32_0 : i32, i32
  }
  func.func @transform_3(%arg0: i32, %arg1: i32) -> (i32, i32) {
    %c0_i32 = arith.constant 0 : i32
    %c0_i32_0 = arith.constant 0 : i32
    %c0_i32_1 = arith.constant 0 : i32
    return %c0_i32, %c0_i32_0 : i32, i32
  }
  func.func @transform_4(%arg0: i32, %arg1: i32) -> (i32, i32) {
    %c0_i32 = arith.constant 0 : i32
    %c0_i32_0 = arith.constant 0 : i32
    %c0_i32_1 = arith.constant 0 : i32
    return %c0_i32, %c0_i32_0 : i32, i32
  }
  func.func @transform_5(%arg0: i32, %arg1: i32) -> (i32, i32) {
    %c0_i32 = arith.constant 0 : i32
    %c0_i32_0 = arith.constant 0 : i32
    %c0_i32_1 = arith.constant 0 : i32
    return %c0_i32, %c0_i32_0 : i32, i32
  }
  func.func @transform_6(%arg0: i32, %arg1: i32) -> (i32, i32, i32) {
    %c0_i32 = arith.constant 0 : i32
    %c0_i32_0 = arith.constant 0 : i32
    %c0_i32_1 = arith.constant 0 : i32
    return %arg0, %c0_i32, %c0_i32_0 : i32, i32, i32
  }
}

</mosaic_0001>

<bundles_post_ra>
// kernel: tpu_custom_call.1
= control target key start
LH: loop header
LB: loop body
LE: loop exit
PB: predicated region body
PF: predicated region fallthrough
CT: control target
= control target key end

     0   :  { %s983_s21 = smov 0   ;;  %s985_s22 = smov 0   ;;  %s1198_s0 = inlined_call_operand.vmem [shape: f32[2,4,256], index: 0, kind: input, shape index: {}]   ;;  %s1199_s1 = inlined_call_operand.vmem [shape: f32[8,4], index: 1, kind: input, shape index: {}]   ;;  %s1200_s2 = inlined_call_operand.vmem [shape: f32[256,50], index: 2, kind: input, shape index: {}]   ;;  %s1201_s3 = inlined_call_operand.vmem [shape: f32[50,256], index: 3, kind: input, shape index: {}]   ;;  %s1202_s4 = inlined_call_operand.vmem [shape: f32[8,1], index: 4, kind: input, shape index: {}]   ;;  %s1203_s5 = inlined_call_operand.vmem [shape: f32[8,50], index: 5, kind: input, shape index: {}]   ;;  %s1204_s6 = inlined_call_operand.vmem [shape: f32[2,12,256], index: 6, kind: output, shape index: {}]  }
   0x1   :  { %s987_s23 = smov 0  }
   0x2 LB: > { %s28_s24 = sadd.s32 1, %s938_s22  ;;  %p782_p0 = scmp.ge.s32.totalorder %s942_s23, 1  ;;  %s942_s23 = sphi %s987_s23, %s16_s23   ;;  %s938_s22 = sphi %s985_s22, %s1208_s22   ;;  %s934_s21 = sphi %s983_s21, %s1207_s21  }
   0x3   : > { %p30_p1 = scmp.ge.s32.totalorder %s28_s24, 2  ;;  %p239_p2 = scmp.lt.s32.totalorder %s942_s23, 3 }
   0x5   : > { %s1210_s24 = smov (%p30_p1, %s28_s24), 0  ;;  %p240_p3 = pnand %p782_p0, %p239_p2 }
   0x6   : > { %v318_v0 = vld [vmem:[%s1200_s2 + $0x80] sm:$0xff] (!%p240_p3)  ;;  %v319_v1 = vld [vmem:[%s1200_s2 + $0x88] sm:$0xff] (!%p240_p3)  ;;  %p277_p4 = scmp.lt.s32.totalorder (!%p240_p3), %s934_s21, 1  ;;  %v320_v5 = vld [vmem:[%s1200_s2 + $0x90] sm:$0xff] (!%p240_p3)  ;;  %v944_v50 = vmov (!%p240_p3), 0.0   ;;  %vm945_vm0 = vmmov (!%p240_p3), 0  }
   0x7   : > { %243 = sbr.rel (%p240_p3) target bundleno = 709 (0x2c5), region = 44  ;;  %v302_v2 = vld [vmem:[%s1200_s2] sm:$0xff] (!%p240_p3)  ;;  %v846_v3 = vpack.c.bf16 (!%p240_p3), %v319_v1, %v318_v0  ;;  %v303_v4 = vld [vmem:[%s1200_s2 + $0x8] sm:$0xff] (!%p240_p3)  ;;  %v321_v6 = vld [vmem:[%s1200_s2 + $0x98] sm:$0xff] (!%p240_p3)  ;;  %841 = vmatprep.subr.mxu1 (!%p240_p3), %v944_v50  ;;  %843 = vmatprep.mubr.msk.f32.mxu1 (!%p240_p3), %vm945_vm0, %v944_v50  ;;  %vm299_vm1 = vcmask (!%p240_p3), 408576   ;;  %v946_v52 = vmov (!%p240_p3), 0  }
   0x8   : > { %v848_v7 = vpack.c.bf16 (!%p240_p3), %v303_v4, %v302_v2  ;;  %v850_v8 = vpack.c.bf16 (!%p240_p3), %v321_v6, %v320_v5  ;;  %v304_v9 = vld [vmem:[%s1200_s2 + $0x10] sm:$0xff] (!%p240_p3)  ;;  %v305_v10 = vld [vmem:[%s1200_s2 + $0x18] sm:$0xff] (!%p240_p3)  ;;  %v322_v11 = vld [vmem:[%s1200_s2 + $0xa0] sm:$0xff] (!%p240_p3)  ;;  %918 = vset.pattern.permute.xlu0 (!%p240_p3), %v946_v52  ;;  %300 = vst.msk [vmem:[#allocation2] sm:$0xff] (!%p240_p3), %vm299_vm1, %v944_v50  ;;  %vm413_vm2 = vcmask (!%p240_p3), 1043456   ;;  %vm409_vm3 = vcmask (!%p240_p3), 31744  }
   0x9   : > { %847 = vmatprep.subr.bf16.mxu0 (!%p240_p3), %v846_v3  ;;  %v323_v12 = vld [vmem:[%s1200_s2 + $0xa8] sm:$0xff] (!%p240_p3)  ;;  %v852_v13 = vpack.c.bf16 (!%p240_p3), %v305_v10, %v304_v9  ;;  %v306_v15 = vld [vmem:[%s1200_s2 + $0x20] sm:$0xff] (!%p240_p3)  ;;  %v324_v17 = vld [vmem:[%s1200_s2 + $0xb0] sm:$0xff] (!%p240_p3)  ;;  %vm523_vm4 = vcmask (!%p240_p3), 1041408  }
   0xa   : > { %849 = vmatpush3.bf16.msra.mxu0 (!%p240_p3), %v848_v7  ;;  %v854_v14 = vpack.c.bf16 (!%p240_p3), %v323_v12, %v322_v11  ;;  %v307_v16 = vld [vmem:[%s1200_s2 + $0x28] sm:$0xff] (!%p240_p3)  ;;  %v325_v18 = vld [vmem:[%s1200_s2 + $0xb8] sm:$0xff] (!%p240_p3)  ;;  %v308_v21 = vld [vmem:[%s1200_s2 + $0x30] sm:$0xff] (!%p240_p3) }
   0xb   : > { %851 = vmatprep.subr.bf16.mxu0 (!%p240_p3), %v850_v8  ;;  %v856_v19 = vpack.c.bf16 (!%p240_p3), %v307_v16, %v306_v15  ;;  %v858_v20 = vpack.c.bf16 (!%p240_p3), %v325_v18, %v324_v17  ;;  %v309_v22 = vld [vmem:[%s1200_s2 + $0x38] sm:$0xff] (!%p240_p3)  ;;  %v326_v23 = vld [vmem:[%s1200_s2 + $0xc0] sm:$0xff] (!%p240_p3)  ;;  %v327_v24 = vld [vmem:[%s1200_s2 + $0xc8] sm:$0xff] (!%p240_p3) }
   0xc   : > { %v860_v27 = vpack.c.bf16 (!%p240_p3), %v309_v22, %v308_v21  ;;  %v862_v28 = vpack.c.bf16 (!%p240_p3), %v327_v24, %v326_v23  ;;  %v310_v29 = vld [vmem:[%s1200_s2 + $0x40] sm:$0xff] (!%p240_p3)  ;;  %v311_v30 = vld [vmem:[%s1200_s2 + $0x48] sm:$0xff] (!%p240_p3)  ;;  %v328_v31 = vld [vmem:[%s1200_s2 + $0xd0] sm:$0xff] (!%p240_p3)  ;;  %v947_v23 = vmov (!%p240_p3), 1966171168  }
   0xd   : > { %v329_v32 = vld [vmem:[%s1200_s2 + $0xd8] sm:$0xff] (!%p240_p3)  ;;  %v864_v33 = vpack.c.bf16 (!%p240_p3), %v311_v30, %v310_v29  ;;  %v312_v35 = vld [vmem:[%s1200_s2 + $0x50] sm:$0xff] (!%p240_p3)  ;;  %v330_v37 = vld [vmem:[%s1200_s2 + $0xe0] sm:$0xff] (!%p240_p3)  ;;  %v605_v24 = vunpack.c.l.s4 (!%p240_p3), %v947_v23 }
   0xe   : > { %s1212_s21 = smov (!%p277_p4, %s934_s21), 1  ;;  %853 = vmatpush3.bf16.msra.mxu0 %v852_v13  ;;  %v866_v34 = vpack.c.bf16 %v329_v32, %v328_v31  ;;  %v313_v36 = vld [vmem:[%s1200_s2 + $0x58] sm:$0xff]  ;;  %v331_v38 = vld [vmem:[%s1200_s2 + $0xe8] sm:$0xff]  ;;  %v314_v41 = vld [vmem:[%s1200_s2 + $0x60] sm:$0xff] }
   0xf   : > { %s802_s25 = sshll.u32 %s1212_s21, 3  ;;  %s803_s13 = sshll.u32 %s1212_s21, 5  ;;  %855 = vmatprep.subr.bf16.mxu0 %v854_v14  ;;  %v868_v39 = vpack.c.bf16 %v313_v36, %v312_v35  ;;  %v870_v40 = vpack.c.bf16 %v331_v38, %v330_v37  ;;  %v315_v42 = vld [vmem:[%s1200_s2 + $0x68] sm:$0xff]  ;;  %v332_v43 = vld [vmem:[%s1200_s2 + $0xf0] sm:$0xff]  ;;  %v333_v44 = vld [vmem:[%s1200_s2 + $0xf8] sm:$0xff] }
  0x10   : > { %s285_s12 = scalar_lea.vmem %s1198_s0, %s802_s25  ;;  %s1061_s27 = scalar_lea.vmem %s1204_s6, %s803_s13  ;;  %v872_v45 = vpack.c.bf16 %v315_v42, %v314_v41  ;;  %v874_v46 = vpack.c.bf16 %v333_v44, %v332_v43  ;;  %v316_v47 = vld [vmem:[%s1200_s2 + $0x70] sm:$0xff]  ;;  %v317_v48 = vld [vmem:[%s1200_s2 + $0x78] sm:$0xff]  ;;  %v496_v51 = vld [vmem:[%s1202_s4] sm:$0xff] }
  0x11   : > { %v301_v25 = vld [vmem:[%s285_s12] sm:$0xff]  ;;  %v876_v49 = vpack.c.bf16 %v317_v48, %v316_v47  ;;  %499 = vperm.xlu0 %918, %v496_v51   ;;  %v507_v57 = vld [vmem:[%s1201_s3 + $0x8] sm:$0xff]  ;;  %v509_v58 = vld [vmem:[%s1201_s3 + $0x18] sm:$0xff] }
  0x12   : > { %v335_v26 = vcombine.high %v301_v25, %v301_v25  ;;  %490 = vst [vmem:[%s1061_s27] sm:$0xf] %v301_v25  ;;  %857 = vmatpush3.bf16.msra.mxu0 %v856_v19  ;;  %v408_v56 = vld [vmem:[%s1199_s1] sm:$0xff]  ;;  %v878_v59 = vpack.c.bf16 %v509_v58, %v507_v57  ;;  %v508_v61 = vld [vmem:[%s1201_s3 + $0x10] sm:$0xff]  ;;  %v511_v63 = vld [vmem:[%s1201_s3 + $0x28] sm:$0xff] }
  0x13   : > { %859 = vmatprep.subr.bf16.mxu0 %v858_v20  ;;  %v506_v60 = vld [vmem:[%s1201_s3] sm:$0xff]  ;;  %v513_v0 = vld [vmem:[%s1201_s3 + $0x38] sm:$0xff]  ;;  %v512_v3 = vld [vmem:[%s1201_s3 + $0x30] sm:$0xff] }
  0x14   : > { %401 = vmatprep.mubr.f32.mxu0 %v335_v26  ;;  %491 = vst [vmem:[%s1061_s27 + $0x8] sm:$0xf] %v335_v26  ;;  %v880_v62 = vpack.c.bf16 %v508_v61, %v506_v60  ;;  %v510_v1 = vld [vmem:[%s1201_s3 + $0x20] sm:$0xff]  ;;  %v882_v2 = vpack.c.bf16 %v513_v0, %v511_v63  ;;  %v515_v5 = vld [vmem:[%s1201_s3 + $0x48] sm:$0xff]  ;;  %v517_v6 = vld [vmem:[%s1201_s3 + $0x58] sm:$0xff]  ;;  %v606_v26 = vunpack.c.0.s8 %v605_v24 }
  0x15   : > { %v884_v4 = vpack.c.bf16 %v512_v3, %v510_v1  ;;  %v886_v7 = vpack.c.bf16 %v517_v6, %v515_v5  ;;  %v514_v8 = vld [vmem:[%s1201_s3 + $0x40] sm:$0xff]  ;;  %v516_v9 = vld [vmem:[%s1201_s3 + $0x50] sm:$0xff]  ;;  %v519_v11 = vld [vmem:[%s1201_s3 + $0x68] sm:$0x3] }
  0x16   : > { %861 = vmatpush3.bf16.msra.mxu0 %v860_v27  ;;  %v888_v10 = vpack.c.bf16 %v516_v9, %v514_v8  ;;  %v518_v12 = vld [vmem:[%s1201_s3 + $0x60] sm:$0x3] }
  0x17   : > { %863 = vmatprep.subr.bf16.mxu0 %v862_v28  ;;  %v407_v13 = vld [vmem:[#allocation2] sm:$0xff] }
  0x18   : > { %v504_v20 = vld [vmem:[%s1203_s5] sm:$0xff] }
  0x1a   : > { %865 = vmatpush3.bf16.msra.mxu0 %v864_v33 }
  0x1b   : > { %867 = vmatprep.subr.bf16.mxu0 %v866_v34 }
  0x1e   : > { %869 = vmatpush3.bf16.msra.mxu0 %v868_v39 }
  0x1f   : > { %871 = vmatprep.subr.bf16.mxu0 %v870_v40 }
  0x22   : > { %873 = vmatpush3.bf16.msra.mxu0 %v872_v45 }
  0x23   : > { %875 = vmatprep.subr.bf16.mxu0 %v874_v46 }
  0x26   : > { %877 = vmatpush3.bf16.msra.mxu0 %v876_v49 }
  0x29   : > { %402 = vmatmul.mubr.f32.vlgmr.msra.gmra.mrb[0].mxu0 %v301_v25  ;;  %v607_v25 = vlaneseq }
  0x2b   : > { %v608_v27 = vshrl.u32 %v607_v25, 7  ;;  %vm1161_vm5 = vcmp.lt.s32.totalorder %v607_v25, 256 }
  0x2d   : > { %v609_v29 = vsub.s32 %v606_v26, %v608_v27 }
  0x90   : > { %v500_v17 = vpop.permute.xlu0 %499 }
  0xfc   : > { %v836_v53 = vpop.f32.mrb[0].mxu0 }
  0xfd   : > { %v837_v54 = vpop.f32.mrb[1].mxu0 }
  0xfe   : > { %v838_v55 = vadd.f32 %v837_v54, %v836_v53 }
 0x100   : > { %842 = vmatpush3.msk.msra.mxu1 %vm413_vm2, %v838_v55 }
 0x101   : > { %844 = vmatmul.mubr.msk.f32.vlgmr.msra.gmra.mrb[0].mxu1 %vm409_vm3, %v408_v56  ;;  %879 = vmatprep.subr.bf16.mxu1 %v878_v59 }
 0x102   : > { %594 = vmatprep.mubr.f32.mxu1 %v944_v50  ;;  %881 = vmatpush1.bf16.msra.mxu1 %v880_v62 }
 0x103   : > { %883 = vmatprep.subr.bf16.mxu1 %v882_v2 }
 0x106   : > { %885 = vmatpush1.bf16.msra.mxu1 %v884_v4 }
 0x107   : > { %887 = vmatprep.subr.bf16.mxu1 %v886_v7 }
 0x10a   : > { %889 = vmatpush1.bf16.msra.mxu1 %v888_v10 }
 0x10b   : > { %789 = vmatprep.subr.msk.mxu1 %vm523_vm4, %v519_v11 }
 0x10e   : > { %790 = vmatpush1.msk.msra.mxu1 %vm523_vm4, %v518_v12 }
 0x1d4   : > { %v483_v14 = vpop.f32.mrb[0].mxu1 }
 0x1d5   : > { %v487_v15 = vadd.f32 %v483_v14, %v407_v13  ;;  %v845_v16 = vpop.f32.mrb[1].mxu1 }
 0x1d7   : > { %489 = vst.msk [vmem:[#allocation2] sm:$0xff] %vm299_vm1, %v487_v15 }
 0x1de   : > { %v495_v18 = vld [vmem:[#allocation2] sm:$0xff] }
 0x1df   : > { %v502_v19 = vadd.f32 %v500_v17, %v495_v18 }
 0x1e1   : > { %v503_v21 = vmax.f32 %v502_v19, 0.0 }
 0x1e3   : > { %v505_v22 = vmul.f32 %v504_v20, %v503_v21 }
 0x1e5   : > { %791 = vmatmul.mubr.msk.f32.vlgmr.msra.gmra.mrb[2].mxu1 %vm299_vm1, %v505_v22 }
 0x2b8   : > { %v596_v28 = vpop.f32.mrb[2].mxu1 }
 0x2b9   : > { %v598_v30 = vpop.f32.mrb[3].mxu1 }
 0x2ba   : > { %v603_v31 = vcombine.low %v596_v28, %v598_v30  ;;  %v648_v32 = vcombine.high %v596_v28, %v598_v30 }
 0x2bc   : > { %v610_v33 = vrot.slane %v603_v31, %v609_v29  ;;  %v655_v34 = vrot.slane %v648_v32, %v609_v29 }
 0x2be   : > { %v617_v36 = vrot.slane %v610_v33, %v609_v29  ;;  %v626_v37 = vcombine.high %v610_v33, %v610_v33  ;;  %v662_v38 = vrot.slane %v655_v34, %v609_v29  ;;  %v667_v39 = vcombine.high %v655_v34, %v655_v34 }
 0x2c0   : > { %792 = vst.msk [vmem:[%s1061_s27 + $0x4] ss:$8 sm:$0x3] %vm1161_vm5, %v617_v36  ;;  %v633_v40 = vrot.slane %v626_v37, %v609_v29  ;;  %v638_v41 = vcombine.high %v617_v36, %v617_v36  ;;  %796 = vst.msk [vmem:[%s1061_s27 + $0x10] ss:$8 sm:$0x3] %vm1161_vm5, %v662_v38  ;;  %v674_v42 = vrot.slane %v667_v39, %v609_v29 }
 0x2c1   : > { %v679_v43 = vcombine.high %v662_v38, %v662_v38 }
 0x2c2   : > { %793 = vst.msk [vmem:[%s1061_s27 + $0x5] ss:$8 sm:$0x3] %vm1161_vm5, %v633_v40  ;;  %794 = vst.msk [vmem:[%s1061_s27 + $0x6] ss:$8 sm:$0x3] %vm1161_vm5, %v638_v41  ;;  %v643_v44 = vcombine.high %v633_v40, %v633_v40  ;;  %v684_v45 = vcombine.high %v674_v42, %v674_v42 }
 0x2c3   : > { %797 = vst.msk [vmem:[%s1061_s27 + $0x11] ss:$8 sm:$0x3] %vm1161_vm5, %v674_v42  ;;  %798 = vst.msk [vmem:[%s1061_s27 + $0x12] ss:$8 sm:$0x3] %vm1161_vm5, %v679_v43 }
 0x2c4   : > { %795 = vst.msk [vmem:[%s1061_s27 + $0x7] ss:$8 sm:$0x3] %vm1161_vm5, %v643_v44  ;;  %799 = vst.msk [vmem:[%s1061_s27 + $0x13] ss:$8 sm:$0x3] %vm1161_vm5, %v684_v45 }
 0x2c5 PF: > { %s16_s23 = sadd.s32 1, %s942_s23   ;;  %s1207_s21 = smov %s938_s22 }
 0x2c6   : > { %p13_p5 = scmp.ge.s32.totalorder %s16_s23, 4   ;;  %s1208_s22 = smov %s1210_s24 }
 0x2c8   :  { %15 = sbr.rel (!%p13_p5) target bundleno = 2 (0x2), region = 93 }

</bundles_post_ra>
